<compile_context>
chip_gen: v7x
topology: tpu7x:2x2x1
jax: 0.10.0
libtpu: 0.0.40
codegen_flags: <defaults>
</compile_context>

<pallas_src>
import jax
import jax.numpy as jnp
from jax.experimental import pallas as pl
from jax.experimental.pallas import tpu as pltpu


def _gru_step_kernel(tok_ref,    # SMEM int32[1]     (scalar prefetch; consumed by index_maps)
                     x_ref,      # VMEM f32[1,1,H]   selected embedding row (gathered via index_map)
                     h_ref,      # VMEM f32[1,H]     h_{t-1}
                     w_ref,      # VMEM f32[2H,4H]   fused gate weights
                     b_ref,      # VMEM f32[1,4H]    fused gate biases
                     out_ref):   # VMEM f32[1,H]     h_t
    del tok_ref
    H = h_ref.shape[-1]
    x = x_ref[0]                                       # (1, H)  == embedded.view(1, 1, -1)
    h = h_ref[...]                                     # (1, H)

    xh = jnp.concatenate([x, h], axis=-1)              # (1, 2H)
    # One MXU push for all gates; (1, 4H) result + one fused bias add.
    g = jnp.dot(xh, w_ref[...], preferred_element_type=jnp.float32) + b_ref[...]

    r = jax.nn.sigmoid(g[:, 0:H])                      # ih_r + hh_r + b_ih_r + b_hh_r
    z = jax.nn.sigmoid(g[:, H:2 * H])                  # ih_z + hh_z + b_ih_z + b_hh_z
    n = jnp.tanh(g[:, 2 * H:3 * H] + r * g[:, 3 * H:4 * H])   # tanh(ih_n + r*(hh_n + b_hh_n))
    out_ref[...] = (1.0 - z) * n + z * h


def pack_gru_params(emb_table, weight_ih, weight_hh, bias_ih, bias_hh):
    """Pack PyTorch-layout nn.GRU params into the fused kernel layout.

    weight_ih / weight_hh : (3H, H), gate order (r, z, n) stacked along rows.
    bias_ih / bias_hh     : (3H,)
    """
    H = weight_ih.shape[1]
    f32 = jnp.float32
    wih_t = jnp.transpose(weight_ih.reshape(3, H, H), (0, 2, 1)).astype(f32)  # [gate][in][out]
    whh_t = jnp.transpose(weight_hh.reshape(3, H, H), (0, 2, 1)).astype(f32)
    bih = bias_ih.reshape(3, H).astype(f32)
    bhh = bias_hh.reshape(3, H).astype(f32)

    zero = jnp.zeros((H, H), f32)
    top = jnp.concatenate([wih_t[0], wih_t[1], wih_t[2], zero], axis=1)   # rows that multiply x
    bot = jnp.concatenate([whh_t[0], whh_t[1], zero, whh_t[2]], axis=1)   # rows that multiply h
    W4 = jnp.concatenate([top, bot], axis=0)                              # (2H, 4H)
    b4 = jnp.concatenate([bih[0] + bhh[0], bih[1] + bhh[1], bih[2], bhh[2]]).reshape(1, 4 * H)

    vocab = emb_table.shape[0]
    return {
        "emb_table": emb_table.astype(f32).reshape(vocab, 1, H),
        "W4": W4,
        "b4": b4,
    }


def encoder_gru_forward(token, hidden, packed):
    """token: int[1]; hidden: f32[1,1,H]. Returns (output f32[1,1,H], hidden f32[1,1,H])."""
    emb = packed["emb_table"]            # (vocab, 1, H), stays in HBM; only one row is DMA'd
    W4 = packed["W4"]                    # (2H, 4H)
    b4 = packed["b4"]                    # (1, 4H)
    vocab, _, H = emb.shape

    tok = jnp.clip(token.reshape(-1)[:1].astype(jnp.int32), 0, vocab - 1)
    h2d = hidden.reshape(1, H).astype(jnp.float32)

    grid_spec = pltpu.PrefetchScalarGridSpec(
        num_scalar_prefetch=1,
        grid=(1,),
        in_specs=[
            # Token-driven row gather: only the selected embedding row moves HBM->VMEM.
            pl.BlockSpec((1, 1, H), lambda i, tok: (tok[0], 0, 0)),
            pl.BlockSpec((1, H), lambda i, tok: (0, 0)),
            pl.BlockSpec((2 * H, 4 * H), lambda i, tok: (0, 0)),
            pl.BlockSpec((1, 4 * H), lambda i, tok: (0, 0)),
        ],
        out_specs=pl.BlockSpec((1, H), lambda i, tok: (0, 0)),
    )

    h_new = pl.pallas_call(
        _gru_step_kernel,
        grid_spec=grid_spec,
        out_shape=jax.ShapeDtypeStruct((1, H), jnp.float32),
    )(tok, emb, h2d, W4, b4)

    h3 = h_new.reshape(1, 1, H)
    return h3, h3                        # output == new hidden for a 1-step GRU


def init_raw_params(key, input_size, hidden_size):
    """PyTorch-style init: nn.Embedding ~ N(0,1); nn.GRU ~ U(-1/sqrt(H), 1/sqrt(H))."""
    H = hidden_size
    k = 1.0 / jnp.sqrt(jnp.float32(H))
    k_emb, k_wih, k_whh, k_bih, k_bhh = jax.random.split(key, 5)
    emb_table = jax.random.normal(k_emb, (input_size, H), jnp.float32)
    weight_ih = jax.random.uniform(k_wih, (3 * H, H), jnp.float32, -k, k)
    weight_hh = jax.random.uniform(k_whh, (3 * H, H), jnp.float32, -k, k)
    bias_ih = jax.random.uniform(k_bih, (3 * H,), jnp.float32, -k, k)
    bias_hh = jax.random.uniform(k_bhh, (3 * H,), jnp.float32, -k, k)
    return emb_table, weight_ih, weight_hh, bias_ih, bias_hh


def _reference_forward(token, hidden, raw):
    """Pure-JAX reference of the PyTorch forward, using the un-packed PyTorch-layout params."""
    emb_table, weight_ih, weight_hh, bias_ih, bias_hh = raw
    H = emb_table.shape[1]
    hp = jax.lax.Precision.HIGHEST
    x = emb_table[token[0]].reshape(1, H)
    h = hidden.reshape(1, H)
    gi = jnp.dot(x, weight_ih.T, precision=hp) + bias_ih    # (1, 3H) gate order (r, z, n)
    gh = jnp.dot(h, weight_hh.T, precision=hp) + bias_hh
    r = jax.nn.sigmoid(gi[:, :H] + gh[:, :H])
    z = jax.nn.sigmoid(gi[:, H:2 * H] + gh[:, H:2 * H])
    n = jnp.tanh(gi[:, 2 * H:] + r * gh[:, 2 * H:])
    h_new = (1.0 - z) * n + z * h
    return h_new.reshape(1, 1, H), h_new.reshape(1, 1, H)


if __name__ == "__main__":
    input_size = 16    # vocabulary size
    hidden_size = 32   # H

    key = jax.random.PRNGKey(0)
    pkey, tkey = jax.random.split(key)
    raw = init_raw_params(pkey, input_size, hidden_size)
    packed = pack_gru_params(*raw)

    token = jax.random.randint(tkey, (1,), 0, input_size, dtype=jnp.int32)
    hidden0 = jnp.zeros((1, 1, hidden_size), dtype=jnp.float32)   # EncoderGRU.initHidden

    output, hidden1 = encoder_gru_forward(token, hidden0, packed)
    jax.block_until_ready((output, hidden1))

    ref_out, ref_hid = _reference_forward(token, hidden0, raw)
    assert output.shape == (1, 1, hidden_size) and hidden1.shape == (1, 1, hidden_size)
    assert jnp.allclose(output, ref_out, atol=1e-5)
    assert jnp.allclose(hidden1, ref_hid, atol=1e-5)

    print("KERNEL_OK")
</pallas_src>

<mosaic_0001>
module attributes {stable_mosaic.version = 11 : i64} {
  func.func @_gru_step_kernel(%arg0: i32, %arg1: memref<1xi32, #tpu.memory_space<smem>>, %arg2: memref<1x1x32xf32, #tpu.memory_space<vmem>>, %arg3: memref<1x32xf32, #tpu.memory_space<vmem>>, %arg4: memref<64x128xf32, #tpu.memory_space<vmem>>, %arg5: memref<1x128xf32, #tpu.memory_space<vmem>>, %arg6: memref<1x32xf32, #tpu.memory_space<vmem>>) attributes {dimension_semantics = [#tpu.dimension_semantics<arbitrary>], iteration_bounds = array<i64: 1>, scalar_prefetch = 1 : i64, scratch_operands = 0 : i64, tpu.core_type = #tpu.core_type<tc>, window_params = [{transform_indices = @transform_0, window_bounds = array<i64: 1, 1, 32>}, {pipeline_mode = #tpu.pipeline_mode<synchronous>, transform_indices = @transform_1, window_bounds = array<i64: 1, 32>}, {pipeline_mode = #tpu.pipeline_mode<synchronous>, transform_indices = @transform_2, window_bounds = array<i64: 64, 128>}, {pipeline_mode = #tpu.pipeline_mode<synchronous>, transform_indices = @transform_3, window_bounds = array<i64: 1, 128>}, {pipeline_mode = #tpu.pipeline_mode<synchronous>, transform_indices = @transform_4, window_bounds = array<i64: 1, 32>}]} {
    %c0 = arith.constant 0 : index
    %c0_0 = arith.constant 0 : index
    %c0_1 = arith.constant 0 : index
    %0 = vector.load %arg2[%c0, %c0_0, %c0_1] : memref<1x1x32xf32, #tpu.memory_space<vmem>>, vector<1x1x32xf32>
    %1 = vector.shape_cast %0 : vector<1x1x32xf32> to vector<1x32xf32>
    %c0_2 = arith.constant 0 : index
    %c0_3 = arith.constant 0 : index
    %2 = vector.load %arg3[%c0_2, %c0_3] : memref<1x32xf32, #tpu.memory_space<vmem>>, vector<1x32xf32>
    %3 = tpu.concatenate %1, %2 in 1 : vector<1x32xf32>, vector<1x32xf32> -> vector<1x64xf32>
    %c0_4 = arith.constant 0 : index
    %c0_5 = arith.constant 0 : index
    %4 = vector.load %arg4[%c0_4, %c0_5] : memref<64x128xf32, #tpu.memory_space<vmem>>, vector<64x128xf32>
    %cst = arith.constant dense<0.000000e+00> : vector<1x128xf32>
    %5 = tpu.matmul %3, %4, %cst {dimension_numbers = #tpu.dot_dimension_numbers<[1], [0], [0], [1], [0, 0, 1, 1], [], []>} : vector<1x64xf32>, vector<64x128xf32>, vector<1x128xf32> -> vector<1x128xf32>
    %c0_6 = arith.constant 0 : index
    %c0_7 = arith.constant 0 : index
    %6 = vector.load %arg5[%c0_6, %c0_7] : memref<1x128xf32, #tpu.memory_space<vmem>>, vector<1x128xf32>
    %7 = arith.addf %5, %6 : vector<1x128xf32>
    %8 = vector.extract_strided_slice %7 {offsets = [0, 0], sizes = [1, 32], strides = [1, 1]} : vector<1x128xf32> to vector<1x32xf32>
    %9 = arith.negf %8 : vector<1x32xf32>
    %10 = math.exp %9 : vector<1x32xf32>
    %cst_8 = arith.constant 1.000000e+00 : f32
    %11 = vector.broadcast %cst_8 : f32 to vector<1x32xf32>
    %12 = arith.addf %11, %10 : vector<1x32xf32>
    %13 = arith.divf %11, %12 : vector<1x32xf32>
    %14 = vector.extract_strided_slice %7 {offsets = [0, 32], sizes = [1, 32], strides = [1, 1]} : vector<1x128xf32> to vector<1x32xf32>
    %15 = arith.negf %14 : vector<1x32xf32>
    %16 = math.exp %15 : vector<1x32xf32>
    %cst_9 = arith.constant 1.000000e+00 : f32
    %17 = vector.broadcast %cst_9 : f32 to vector<1x32xf32>
    %18 = arith.addf %17, %16 : vector<1x32xf32>
    %19 = arith.divf %17, %18 : vector<1x32xf32>
    %20 = vector.extract_strided_slice %7 {offsets = [0, 64], sizes = [1, 32], strides = [1, 1]} : vector<1x128xf32> to vector<1x32xf32>
    %21 = vector.extract_strided_slice %7 {offsets = [0, 96], sizes = [1, 32], strides = [1, 1]} : vector<1x128xf32> to vector<1x32xf32>
    %22 = arith.mulf %13, %21 : vector<1x32xf32>
    %23 = arith.addf %20, %22 : vector<1x32xf32>
    %24 = math.tanh %23 : vector<1x32xf32>
    %cst_10 = arith.constant 1.000000e+00 : f32
    %25 = vector.broadcast %cst_10 : f32 to vector<1x32xf32>
    %26 = arith.subf %25, %19 : vector<1x32xf32>
    %27 = arith.mulf %26, %24 : vector<1x32xf32>
    %28 = arith.mulf %19, %2 : vector<1x32xf32>
    %29 = arith.addf %27, %28 : vector<1x32xf32>
    %c0_11 = arith.constant 0 : index
    %c0_12 = arith.constant 0 : index
    %30 = vector.load %arg6[%c0_11, %c0_12] : memref<1x32xf32, #tpu.memory_space<vmem>>, vector<1x32xf32>
    tpu.vector_store %arg6[%c0_11, %c0_12], %29 {strides = array<i32>} : memref<1x32xf32, #tpu.memory_space<vmem>>, vector<1x32xf32>,
    return
  }
  func.func @transform_0(%arg0: i32, %arg1: memref<1xi32, #tpu.memory_space<smem>>) -> (i32, i32, i32) {
    %c0 = arith.constant 0 : index
    %0 = memref.load %arg1[%c0] : memref<1xi32, #tpu.memory_space<smem>>
    %c0_i32 = arith.constant 0 : i32
    %c0_i32_0 = arith.constant 0 : i32
    %c0_i32_1 = arith.constant 0 : i32
    return %0, %c0_i32, %c0_i32_0 : i32, i32, i32
  }
  func.func @transform_1(%arg0: i32, %arg1: memref<1xi32, #tpu.memory_space<smem>>) -> (i32, i32) {
    %c0_i32 = arith.constant 0 : i32
    %c0_i32_0 = arith.constant 0 : i32
    %c0_i32_1 = arith.constant 0 : i32
    return %c0_i32, %c0_i32_0 : i32, i32
  }
  func.func @transform_2(%arg0: i32, %arg1: memref<1xi32, #tpu.memory_space<smem>>) -> (i32, i32) {
    %c0_i32 = arith.constant 0 : i32
    %c0_i32_0 = arith.constant 0 : i32
    %c0_i32_1 = arith.constant 0 : i32
    return %c0_i32, %c0_i32_0 : i32, i32
  }
  func.func @transform_3(%arg0: i32, %arg1: memref<1xi32, #tpu.memory_space<smem>>) -> (i32, i32) {
    %c0_i32 = arith.constant 0 : i32
    %c0_i32_0 = arith.constant 0 : i32
    %c0_i32_1 = arith.constant 0 : i32
    return %c0_i32, %c0_i32_0 : i32, i32
  }
  func.func @transform_4(%arg0: i32, %arg1: memref<1xi32, #tpu.memory_space<smem>>) -> (i32, i32) {
    %c0_i32 = arith.constant 0 : i32
    %c0_i32_0 = arith.constant 0 : i32
    %c0_i32_1 = arith.constant 0 : i32
    return %c0_i32, %c0_i32_0 : i32, i32
  }
}

</mosaic_0001>

<bundles_post_ra>
// kernel: tpu_custom_call.1
= control target key start
LH: loop header
LB: loop body
LE: loop exit
PB: predicated region body
PF: predicated region fallthrough
CT: control target
= control target key end

     0   :  { %11 = vsyncpa [#allocation5], 0  ;;  %s412_s0 = inlined_call_operand.<no memory space> [shape: s32[1], index: 0, kind: input, shape index: {}]   ;;  %s413_s1 = inlined_call_operand.hbm [shape: f32[16,1,32], index: 1, kind: input, shape index: {}]   ;;  %s414_s2 = inlined_call_operand.vmem [shape: f32[1,32], index: 2, kind: input, shape index: {}]   ;;  %s415_s3 = inlined_call_operand.hbm [shape: f32[64,128], index: 3, kind: input, shape index: {}]   ;;  %s416_s4 = inlined_call_operand.vmem [shape: f32[1,128], index: 4, kind: input, shape index: {}]   ;;  %s417_s5 = inlined_call_operand.hbm [shape: f32[1,32], index: 5, kind: output, shape index: {}]  }
   0x1   :  { %12 = vsyncpa [#allocation8], 0 }
   0x2   :  { %13 = vsyncpa [#allocation6], 0  ;;  %s194_s20 = sshll.u32 %s412_s0, 4  ;;  %s329_s24 = smov [#allocation4]  }
   0x3   :  { %s21_s23 = scalar_lea.hbm %s413_s1, %s194_s20  ;;  %s23_s25 = sshll.u32 %s329_s24, 4  ;;  %s24_s25 = int_to_ptr.vmem [resolvable:$true] %s23_s25 }
   0x4   :  { %s255_s26 = scalar_lea.hbm %s21_s23, 16  ;;  %s257_s29 = scalar_lea.hbm %s413_s1, 256 }
   0x5   :  { %p256_p0 = scmp.ne.s32.totalorder %s21_s23, %s255_s26  ;;  %p258_p1 = scmp.lt.u32.totalorder %s21_s23, %s413_s1 }
   0x6   :  { %p259_p2 = scmp.lt.u32.totalorder %s257_s29, %s255_s26  ;;  %p261_p4 = scmp.lt.u32.totalorder %s255_s26, %s21_s23 }
   0x8   :  { %p260_p3 = por %p259_p2, %p258_p1 }
   0xa   :  { %p262_p5 = por %p261_p4, %p260_p3 }
   0xc   :  { %p263_p6 = pnand %p262_p5, %p256_p0 }
   0xe   :  { %266 = shalt.err (!%p263_p6)
}
   0xf   :  { %s267_s0 = scalar_lea.vmem %s24_s25, 16  ;;  %s271_s7 = scalar_lea.vmem %s24_s25, 32 }
  0x10   :  { %p268_p7 = scmp.ne.s32.totalorder %s24_s25, %s267_s0  ;;  %p272_p8 = scmp.lt.s32.totalorder %s24_s25, %s24_s25 }
  0x11   :  { %p273_p9 = scmp.lt.s32.totalorder %s271_s7, %s267_s0 }
  0x13   :  { %p274_p10 = por %p273_p9, %p272_p8 }
  0x15   :  { %p275_p11 = pnand %p274_p10, %p268_p7 }
  0x17   :  { %278 = shalt.err (!%p275_p11)
}
  0x18   :  { %26 = dma.hbm_to_vmem [thread:$0]  %s21_s23, 16, %s24_s25, [#allocation5]  }
  0x19   :  { %s330_s8 = smov [#allocation7]   ;;  %s279_s11 = scalar_lea.hbm %s415_s3, 1024 }
  0x1a   :  { %s34_s9 = sshll.u32 %s330_s8, 4  ;;  %p280_p12 = scmp.ne.s32.totalorder %s415_s3, %s279_s11  ;;  %s35_s9 = int_to_ptr.vmem [resolvable:$true] %s34_s9 }
  0x1b   :  { %p283_p13 = scmp.lt.u32.totalorder %s279_s11, %s415_s3 }
  0x1d   :  { %p285_p0 = pnand %p283_p13, %p280_p12 }
  0x1f   :  { %288 = shalt.err (!%p285_p0)
}
  0x20   :  { %s289_s16 = scalar_lea.vmem %s35_s9, 1024  ;;  %p294_p2 = scmp.lt.s32.totalorder %s35_s9, %s35_s9 }
  0x21   :  { %p290_p1 = scmp.ne.s32.totalorder %s35_s9, %s289_s16  ;;  %p295_p3 = scmp.lt.s32.totalorder %s289_s16, %s289_s16 }
  0x23   :  { %p296_p4 = por %p295_p3, %p294_p2 }
  0x25   :  { %p297_p5 = pnand %p296_p4, %p290_p1 }
  0x27   :  { %300 = shalt.err (!%p297_p5)
}
  0x28   :  { %s331_s17 = smov 128   ;;  %s332_s18 = smov 8  }
  0x29   :  { %40 = dma.hbm_to_vmem [thread:$0]  %s415_s3, 1024, %s35_s9, [#allocation8], %s331_s17, %s331_s17, %s332_s18  }
  0x2a   :  { %323 = dma.done.wait [#allocation5], 16  }
  0x2b   :  { %324 = vsyncadd [#allocation5], 4294967280 }
  0x2c   :  { %325 = dma.done.wait [#allocation8], 1024  }
  0x2d   :  { %326 = vsyncadd [#allocation8], 4294966272  ;;  %v333_v0 = vmov 0.0|0.0   ;;  %vm334_vm0 = vmmov 0   ;;  %v335_v1 = vmov 0.0   ;;  %v62_v3 = vld [vmem:[#allocation7] sm:$0xff] }
  0x2e   :  { %226 = vmatprep.subr.bf16.mxu0 %v333_v0  ;;  %223 = vmatprep.mubr.msk.f32.mxu0 %vm334_vm0, %v335_v1  ;;  %v195_v2 = vld [vmem:[%s414_s2] ss:$0 sm:$0xff]  ;;  %v63_v4 = vld [vmem:[#allocation7 + $0x8] sm:$0xff]  ;;  %s336_s23 = smov 32   ;;  %v64_v6 = vld [vmem:[#allocation7 + $0x10] sm:$0xff]  ;;  %vm60_vm1 = vcmask 261120  }
  0x2f   :  { %57 = vrot.lane.b32.xlu0 %v195_v2, %s336_s23  ;;  %v227_v5 = vpack.c.bf16 %v63_v4, %v62_v3  ;;  %v65_v7 = vld [vmem:[#allocation7 + $0x18] sm:$0xff]  ;;  %v66_v9 = vld [vmem:[#allocation7 + $0x20] sm:$0xff]  ;;  %v67_v10 = vld [vmem:[#allocation7 + $0x28] sm:$0xff]  ;;  %vm71_vm2 = vcmask 523264   ;;  %s337_s24 = smov 64   ;;  %s338_s25 = smov 96  }
  0x30   :  { %v230_v8 = vpack.c.bf16 %v65_v7, %v64_v6  ;;  %v233_v11 = vpack.c.bf16 %v67_v10, %v66_v9  ;;  %v68_v12 = vld [vmem:[#allocation7 + $0x30] sm:$0xff]  ;;  %v69_v13 = vld [vmem:[#allocation7 + $0x38] sm:$0xff]  ;;  %vm174_vm3 = vcmask 253952  }
  0x31   :  { %228 = vmatpush3.bf16.msra.mxu0 %v227_v5  ;;  %v236_v14 = vpack.c.bf16 %v69_v13, %v68_v12  ;;  %v50_v15 = vld [vmem:[#allocation4] sm:$0x1] }
  0x32   :  { %229 = vmatprep.subr.bf16.mxu0 %v333_v0  ;;  %v70_v18 = vld [vmem:[%s416_s4] sm:$0x1]  ;;  %s339_s4 = smov [#allocation9]  }
  0x33   :  { %s182_s26 = sshll.u32 %s339_s4, 4  ;;  %s183_s26 = int_to_ptr.vmem [resolvable:$true] %s182_s26 }
  0x34   :  { %s301_s27 = scalar_lea.vmem %s183_s26, 16  ;;  %s305_s28 = scalar_lea.vmem %s183_s26, 32 }
  0x35   :  { %231 = vmatpush3.bf16.msra.mxu0 %v230_v8  ;;  %p302_p6 = scmp.ne.s32.totalorder %s183_s26, %s301_s27  ;;  %p306_p7 = scmp.lt.s32.totalorder %s183_s26, %s183_s26 }
  0x36   :  { %232 = vmatprep.subr.bf16.mxu0 %v333_v0  ;;  %p307_p8 = scmp.lt.s32.totalorder %s305_s28, %s301_s27 }
  0x38   :  { %p308_p9 = por %p307_p8, %p306_p7 }
  0x39   :  { %234 = vmatpush3.bf16.msra.mxu0 %v233_v11 }
  0x3a   :  { %235 = vmatprep.subr.bf16.mxu0 %v333_v0  ;;  %p309_p10 = pnand %p308_p9, %p302_p6 }
  0x3d   :  { %237 = vmatpush3.bf16.msra.mxu0 %v236_v14 }
  0xa1   :  { %v58_v16 = vpop.permute.xlu0 %57 }
  0xa2   :  { %v61_v17 = vsel %vm60_vm1, %v50_v15, %v58_v16 }
  0xa3   :  { %224 = vmatmul.mubr.msk.f32.vlgmr.msra.gmra.mrb[0].mxu0 %vm71_vm2, %v61_v17 }
 0x176   :  { %v141_v19 = vpop.f32.mrb[0].mxu0 }
 0x177   :  { %v142_v20 = vadd.f32 %v141_v19, %v70_v18  ;;  %v225_v21 = vpop.f32.mrb[1].mxu0 }
 0x179   :  { %152 = vrot.lane.b32.xlu0 %v142_v20, %s336_s23  ;;  %v197_v22 = vmul.f32 -1.442695, %v142_v20 }
 0x17b   :  { %249 = vpow2.f32 %v197_v22 }
 0x185   :  { %v250_v23 = vpop.eup %249 }
 0x186   :  { %v148_v24 = vadd.f32 1.0, %v250_v23 }
 0x188   :  { %251 = vrcp.f32 %v148_v24 }
 0x192   :  { %v252_v25 = vpop.eup %251 }
 0x193   :  { %v162_v31 = vsub.f32 1.0, %v252_v25  ;;  %v168_v33 = vmul.f32 %v252_v25, %v58_v16 }
 0x1eb   :  { %v153_v26 = vpop.permute.xlu0 %152 }
 0x1ec   :  { %v155_v27 = vmul.f32 %v252_v25, %v153_v26 }
 0x1ee   :  { %157 = vrot.lane.b32.xlu1 %v155_v27, %s337_s24 }
 0x260   :  { %v158_v28 = vpop.permute.xlu1 %157 }
 0x261   :  { %v160_v29 = vadd.f32 %v158_v28, %v142_v20 }
 0x263   :  { %253 = vtanh.f32 %v160_v29 }
 0x26d   :  { %v254_v30 = vpop.eup %253 }
 0x26e   :  { %164 = vrot.lane.b32.xlu1 %v254_v30, %s338_s25 }
 0x2e0   :  { %v165_v32 = vpop.permute.xlu1 %164 }
 0x2e1   :  { %v167_v34 = vmul.f32 %v165_v32, %v162_v31 }
 0x2e3   :  { %v169_v35 = vadd.f32 %v168_v33, %v167_v34 }
 0x2e5   :  { %171 = vrot.lane.b32.xlu0 %v169_v35, %s338_s25 }
 0x357   :  { %v172_v36 = vpop.permute.xlu0 %171 }
 0x358   :  { %175 = vst.msk [vmem:[#allocation9] sm:$0x1] %vm174_vm3, %v172_v36 }
 0x359   :  { %312 = shalt.err (!%p309_p10)
}
 0x35a   :  { %s313_s6 = scalar_lea.hbm %s417_s5, 16 }
 0x35b   :  { %p314_p11 = scmp.ne.s32.totalorder %s417_s5, %s313_s6  ;;  %p317_p12 = scmp.lt.u32.totalorder %s313_s6, %s417_s5 }
 0x35d   :  { %p319_p13 = pnand %p317_p12, %p314_p11 }
 0x35f   :  { %322 = shalt.err (!%p319_p13)
}
 0x360   :  { %185 = dma.vmem_to_hbm [thread:$0]  %s183_s26, 16, %s417_s5, [#allocation6]  }
 0x361   :  { %327 = dma.done.wait [#allocation6], 16  }
 0x362   :  { %328 = vsyncadd [#allocation6], 4294967280 }
 0x363   :  { %189 = vsyncpa [#allocation5], 1 }
 0x364   :  { %190 = vsyncpa [#allocation8], 1 }
 0x365   :  { %191 = vsyncpa [#allocation6], 1 }

</bundles_post_ra>
